<compile_context>
chip_gen: v7x
topology: tpu7x:2x2x1
jax: 0.10.0
libtpu: 0.0.40
codegen_flags: <defaults>
</compile_context>

<pallas_src>
import jax
import jax.numpy as jnp
from jax.experimental import pallas as pl
from jax.experimental.pallas import tpu as pltpu


def _round_up(n, m):
    return ((n + m - 1) // m) * m


# ----------------------------------------------------------------------------
# Pallas kernel
# ----------------------------------------------------------------------------
def _mlp_kernel(x_ref, w1_ref, b1_ref, w2_ref, b2_ref, wo_ref, bo_ref, out_ref):
    x = x_ref[...]                                                   # (TB, Dp) bf16

    # Layer 1: MXU matmul (bf16 in, f32 acc) + f32 bias/ReLU on the VPU.
    h1 = jnp.dot(x, w1_ref[...], preferred_element_type=jnp.float32)
    h1 = jnp.maximum(h1 + b1_ref[...], 0.0)                          # (TB, H1) f32

    # Layer 2.
    h2 = jnp.dot(h1.astype(jnp.bfloat16), w2_ref[...],
                 preferred_element_type=jnp.float32)
    h2 = jnp.maximum(h2 + b2_ref[...], 0.0)                          # (TB, H2) f32

    # Output projection (H2 -> 1): VPU multiply + lane reduction (XLU),
    # not an N=1 MXU matmul.
    logit = jnp.sum(h2 * wo_ref[...], axis=-1, keepdims=True) + bo_ref[...]

    # Sigmoid via EUP: exp + approximate reciprocal; clip keeps it in [0, 1].
    e = jnp.exp(-logit)
    p = pl.reciprocal(1.0 + e, approx=True)
    out_ref[...] = jnp.clip(p, 0.0, 1.0)


def mlp_forward_pallas(x, w1, b1, w2, b2, wo_row, bo, *, tile_b):
    """x: (Bp, Dp) bf16, weights bf16, biases/wo_row/bo f32. Returns (Bp, 1) f32."""
    Bp, Dp = x.shape
    H1 = w1.shape[1]
    H2 = w2.shape[1]
    grid = (Bp // tile_b,)

    flops = 2 * Bp * (Dp * H1 + H1 * H2 + H2)
    bytes_accessed = (x.size * 2 + w1.size * 2 + w2.size * 2
                      + (b1.size + b2.size + wo_row.size + bo.size) * 4
                      + Bp * 4)

    return pl.pallas_call(
        _mlp_kernel,
        out_shape=jax.ShapeDtypeStruct((Bp, 1), jnp.float32),
        grid_spec=pltpu.PrefetchScalarGridSpec(
            num_scalar_prefetch=0,
            grid=grid,
            in_specs=[
                pl.BlockSpec((tile_b, Dp), lambda i: (i, 0)),   # activations: tiled over batch
                pl.BlockSpec((Dp, H1), lambda i: (0, 0)),       # weights stay VMEM-resident
                pl.BlockSpec((1, H1), lambda i: (0, 0)),
                pl.BlockSpec((H1, H2), lambda i: (0, 0)),
                pl.BlockSpec((1, H2), lambda i: (0, 0)),
                pl.BlockSpec((1, H2), lambda i: (0, 0)),
                pl.BlockSpec((1, 1), lambda i: (0, 0)),
            ],
            out_specs=pl.BlockSpec((tile_b, 1), lambda i: (i, 0)),
        ),
        compiler_params=pltpu.CompilerParams(
            dimension_semantics=("parallel",)),
        cost_estimate=pl.CostEstimate(
            flops=flops, transcendentals=Bp, bytes_accessed=bytes_accessed),
    )(x, w1, b1, w2, b2, wo_row, bo)


# ----------------------------------------------------------------------------
# Model: parameter setup + forward glue. Dropout is eval-mode identity.
# ----------------------------------------------------------------------------
class MLPPallas:
    _TILE_B_MAX = 512  # 2 double-buffered (512,256) bf16 blocks = 512 KB << 64 MiB (v7x VMEM)

    def __init__(self, model_param, key):
        self.batch_size = model_param["batch_size"]
        self.day = model_param["day"]
        self.a_feat_size = model_param["a_feat_size"]
        self.u_feat_size = model_param["u_feat_size"]
        self.a_field_size = model_param["a_field_size"]
        self.u_field_size = model_param["u_field_size"]
        self.embedding_size = model_param["embedding_size"]
        self.deep_layers = model_param["deep_layers"]

        input_size = (self.day * self.a_field_size * self.embedding_size
                      + self.u_field_size * self.embedding_size)
        h1, h2 = self.deep_layers

        # Lane-aligned (multiple-of-128) padded dims.
        self.d_in = input_size
        self.d_pad = _round_up(input_size, 128)
        self.h1_pad = _round_up(h1, 128)
        self.h2_pad = _round_up(h2, 128)

        ks = jax.random.split(key, 10)
        # Embedding tables ~ N(0, 1) like torch.nn.Embedding default.
        self.a_embeddings = jax.random.normal(
            ks[0], (self.a_feat_size, self.embedding_size), jnp.float32)
        self.u_embeddings = jax.random.normal(
            ks[1], (self.u_feat_size, self.embedding_size), jnp.float32)

        def linear_init(k, fan_in, fan_out):
            kw, kb = jax.random.split(k)
            bound = float(fan_in) ** -0.5
            w = jax.random.uniform(kw, (fan_in, fan_out), jnp.float32, -bound, bound)
            b = jax.random.uniform(kb, (1, fan_out), jnp.float32, -bound, bound)
            return w, b

        def pad2(a, rows, cols):
            return jnp.pad(a, ((0, rows - a.shape[0]), (0, cols - a.shape[1])))

        w1, b1 = linear_init(ks[2], input_size, h1)
        w2, b2 = linear_init(ks[3], h1, h2)
        wo, bo = linear_init(ks[4], h2, 1)

        # Zero-padded, bf16 weights for the MXU; f32 biases for the VPU.
        self.w1 = pad2(w1, self.d_pad, self.h1_pad).astype(jnp.bfloat16)
        self.b1 = pad2(b1, 1, self.h1_pad)                      # f32
        self.w2 = pad2(w2, self.h1_pad, self.h2_pad).astype(jnp.bfloat16)
        self.b2 = pad2(b2, 1, self.h2_pad)                      # f32
        self.wo_row = pad2(wo.T, 1, self.h2_pad)                # (1, H2_pad) f32
        self.bo = bo.reshape(1, 1)                              # (1, 1) f32

    def _tile_b(self, B):
        if B >= self._TILE_B_MAX:
            return self._TILE_B_MAX
        return _round_up(B, 8)

    def forward(self, ui, uv, ai, av, y=None, lossFun="BCE"):
        B = self.batch_size
        # Embedding lookups + value scaling (JAX glue).
        # TODO(synk): fuse the embedding gather/scale/concat into the Pallas
        # kernel (scalar-prefetched indices + VMEM-resident tables) to avoid
        # the extra HBM round trip for deep_input.
        a_emb = jnp.take(self.a_embeddings, ai, axis=0)   # (B, day, a_field, emb)
        u_emb = jnp.take(self.u_embeddings, ui, axis=0)   # (B, u_field, emb)
        a_emb = a_emb * av.reshape(-1, self.day, self.a_field_size, 1)
        u_emb = u_emb * uv.reshape(-1, self.u_field_size, 1)
        deep_input = jnp.concatenate(
            (a_emb.reshape(B, -1), u_emb.reshape(B, -1)), axis=1)   # (B, d_in)

        # Pad feature dim to a lane-aligned width and batch to a tile multiple,
        # then cast to bf16 for the MXU.
        tile_b = self._tile_b(B)
        Bp = _round_up(B, tile_b)
        x = jnp.pad(deep_input,
                    ((0, Bp - B), (0, self.d_pad - self.d_in))).astype(jnp.bfloat16)

        # Dropout: eval mode -> identity (inference semantics).
        out_p = mlp_forward_pallas(x, self.w1, self.b1, self.w2, self.b2,
                                   self.wo_row, self.bo, tile_b=tile_b)
        out = out_p[:B]

        eps = 1e-05
        if y is not None:
            y_true_bool = jnp.where(y >= eps, 1.0, 0.0)
            # TODO(synk): setMask() is undefined in the reference source; pass-through.
            filtered_y, filtered_pred_y = y, out
            if lossFun == "BCE":
                p = jnp.clip(out, 1e-12, 1.0 - 1e-12)
                loss = -jnp.mean(y_true_bool * jnp.log(p)
                                 + (1.0 - y_true_bool) * jnp.log(1.0 - p))
            else:
                loss = jnp.mean((out - y) ** 2)
            return loss, out, filtered_y, filtered_pred_y
        else:
            filtered_y, filtered_pred_y = None, out
            return out, filtered_y, filtered_pred_y


# ----------------------------------------------------------------------------
if __name__ == "__main__":
    model_param = {
        "device": "tpu",
        "batch_size": 8,
        "day": 2,
        "a_feat_size": 32,
        "u_feat_size": 24,
        "a_field_size": 4,
        "u_field_size": 4,
        "embedding_size": 16,
        "deep_layers": [64, 32],
        "batch_norm": 1,
        "batch_norm_decay": 0.995,
        "dropout_p": 0.0,
    }

    key = jax.random.PRNGKey(0)
    k_model, k_ui, k_uv, k_ai, k_av, k_y = jax.random.split(key, 6)

    model = MLPPallas(model_param, k_model)

    B = model_param["batch_size"]
    ui = jax.random.randint(k_ui, (B, model_param["u_field_size"]),
                            0, model_param["u_feat_size"], dtype=jnp.int32)
    uv = jax.random.uniform(k_uv, (B, model_param["u_field_size"]), jnp.float32)
    ai = jax.random.randint(k_ai, (B, model_param["day"], model_param["a_field_size"]),
                            0, model_param["a_feat_size"], dtype=jnp.int32)
    av = jax.random.uniform(k_av, (B, model_param["day"], model_param["a_field_size"]),
                            jnp.float32)
    y = (jax.random.uniform(k_y, (B, 1), jnp.float32) > 0.5).astype(jnp.float32)

    loss, out, filtered_y, filtered_pred_y = model.forward(ui, uv, ai, av, y, lossFun="BCE")
    jax.block_until_ready((loss, out))

    assert out.shape == (B, 1)
    assert bool(jnp.all((out >= 0.0) & (out <= 1.0)))
    assert bool(jnp.isfinite(loss))
    print("KERNEL_OK")
</pallas_src>

<mosaic_0001>
module attributes {stable_mosaic.version = 11 : i64} {
  func.func @_mlp_kernel(%arg0: i32, %arg1: memref<8x256xbf16, #tpu.memory_space<vmem>>, %arg2: memref<256x128xbf16, #tpu.memory_space<vmem>>, %arg3: memref<1x128xf32, #tpu.memory_space<vmem>>, %arg4: memref<128x128xbf16, #tpu.memory_space<vmem>>, %arg5: memref<1x128xf32, #tpu.memory_space<vmem>>, %arg6: memref<1x128xf32, #tpu.memory_space<vmem>>, %arg7: memref<1x1xf32, #tpu.memory_space<vmem>>, %arg8: memref<8x1xf32, #tpu.memory_space<vmem>>) attributes {dimension_semantics = [#tpu.dimension_semantics<parallel>], iteration_bounds = array<i64: 1>, scalar_prefetch = 0 : i64, scratch_operands = 0 : i64, tpu.core_type = #tpu.core_type<tc>, window_params = [{transform_indices = @transform_0, window_bounds = array<i64: 8, 256>}, {pipeline_mode = #tpu.pipeline_mode<synchronous>, transform_indices = @transform_1, window_bounds = array<i64: 256, 128>}, {pipeline_mode = #tpu.pipeline_mode<synchronous>, transform_indices = @transform_2, window_bounds = array<i64: 1, 128>}, {pipeline_mode = #tpu.pipeline_mode<synchronous>, transform_indices = @transform_3, window_bounds = array<i64: 128, 128>}, {pipeline_mode = #tpu.pipeline_mode<synchronous>, transform_indices = @transform_4, window_bounds = array<i64: 1, 128>}, {pipeline_mode = #tpu.pipeline_mode<synchronous>, transform_indices = @transform_5, window_bounds = array<i64: 1, 128>}, {pipeline_mode = #tpu.pipeline_mode<synchronous>, transform_indices = @transform_6, window_bounds = array<i64: 1, 1>}, {transform_indices = @transform_7, window_bounds = array<i64: 8, 1>}]} {
    %c0 = arith.constant 0 : index
    %c0_0 = arith.constant 0 : index
    %0 = vector.load %arg1[%c0, %c0_0] : memref<8x256xbf16, #tpu.memory_space<vmem>>, vector<8x256xbf16>
    %c0_1 = arith.constant 0 : index
    %c0_2 = arith.constant 0 : index
    %1 = vector.load %arg2[%c0_1, %c0_2] : memref<256x128xbf16, #tpu.memory_space<vmem>>, vector<256x128xbf16>
    %cst = arith.constant dense<0.000000e+00> : vector<8x128xf32>
    %2 = tpu.matmul %0, %1, %cst {dimension_numbers = #tpu.dot_dimension_numbers<[1], [0], [0], [1], [0, 0, 1, 1], [], []>} : vector<8x256xbf16>, vector<256x128xbf16>, vector<8x128xf32> -> vector<8x128xf32>
    %c0_3 = arith.constant 0 : index
    %c0_4 = arith.constant 0 : index
    %3 = vector.load %arg3[%c0_3, %c0_4] : memref<1x128xf32, #tpu.memory_space<vmem>>, vector<1x128xf32>
    %4 = vector.broadcast %3 : vector<1x128xf32> to vector<8x128xf32>
    %5 = arith.addf %2, %4 : vector<8x128xf32>
    %cst_5 = arith.constant 0.000000e+00 : f32
    %6 = vector.broadcast %cst_5 : f32 to vector<8x128xf32>
    %7 = arith.maximumf %5, %6 : vector<8x128xf32>
    %8 = arith.truncf %7 : vector<8x128xf32> to vector<8x128xbf16>
    %c0_6 = arith.constant 0 : index
    %c0_7 = arith.constant 0 : index
    %9 = vector.load %arg4[%c0_6, %c0_7] : memref<128x128xbf16, #tpu.memory_space<vmem>>, vector<128x128xbf16>
    %cst_8 = arith.constant dense<0.000000e+00> : vector<8x128xf32>
    %10 = tpu.matmul %8, %9, %cst_8 {dimension_numbers = #tpu.dot_dimension_numbers<[1], [0], [0], [1], [0, 0, 1, 1], [], []>} : vector<8x128xbf16>, vector<128x128xbf16>, vector<8x128xf32> -> vector<8x128xf32>
    %c0_9 = arith.constant 0 : index
    %c0_10 = arith.constant 0 : index
    %11 = vector.load %arg5[%c0_9, %c0_10] : memref<1x128xf32, #tpu.memory_space<vmem>>, vector<1x128xf32>
    %12 = vector.broadcast %11 : vector<1x128xf32> to vector<8x128xf32>
    %13 = arith.addf %10, %12 : vector<8x128xf32>
    %cst_11 = arith.constant 0.000000e+00 : f32
    %14 = vector.broadcast %cst_11 : f32 to vector<8x128xf32>
    %15 = arith.maximumf %13, %14 : vector<8x128xf32>
    %c0_12 = arith.constant 0 : index
    %c0_13 = arith.constant 0 : index
    %16 = vector.load %arg6[%c0_12, %c0_13] : memref<1x128xf32, #tpu.memory_space<vmem>>, vector<1x128xf32>
    %17 = vector.broadcast %16 : vector<1x128xf32> to vector<8x128xf32>
    %18 = arith.mulf %15, %17 : vector<8x128xf32>
    %cst_14 = arith.constant dense<0.000000e+00> : vector<8xf32>
    %19 = vector.multi_reduction <add>, %18, %cst_14 [1] : vector<8x128xf32> to vector<8xf32>
    %20 = vector.shape_cast %19 : vector<8xf32> to vector<8x1xf32>
    %c0_15 = arith.constant 0 : index
    %c0_16 = arith.constant 0 : index
    %21 = vector.load %arg7[%c0_15, %c0_16] : memref<1x1xf32, #tpu.memory_space<vmem>>, vector<1x1xf32>
    %22 = vector.broadcast %21 : vector<1x1xf32> to vector<8x1xf32>
    %23 = arith.addf %20, %22 : vector<8x1xf32>
    %cst_17 = arith.constant 0.000000e+00 : f32
    %24 = vector.broadcast %cst_17 : f32 to vector<8x1xf32>
    %25 = arith.subf %24, %23 : vector<8x1xf32>
    %26 = math.exp %25 : vector<8x1xf32>
    %cst_18 = arith.constant 1.000000e+00 : f32
    %27 = vector.broadcast %cst_18 : f32 to vector<8x1xf32>
    %28 = arith.addf %27, %26 : vector<8x1xf32>
    %29 = tpu.reciprocal %28 {approx = true} : vector<8x1xf32> -> vector<8x1xf32>
    %cst_19 = arith.constant 0.000000e+00 : f32
    %cst_20 = arith.constant 1.000000e+00 : f32
    %30 = vector.broadcast %cst_19 : f32 to vector<8x1xf32>
    %31 = arith.maximumf %30, %29 : vector<8x1xf32>
    %32 = vector.broadcast %cst_20 : f32 to vector<8x1xf32>
    %33 = arith.minimumf %32, %31 : vector<8x1xf32>
    %c0_21 = arith.constant 0 : index
    %c0_22 = arith.constant 0 : index
    %34 = vector.load %arg8[%c0_21, %c0_22] : memref<8x1xf32, #tpu.memory_space<vmem>>, vector<8x1xf32>
    tpu.vector_store %arg8[%c0_21, %c0_22], %33 {strides = array<i32>} : memref<8x1xf32, #tpu.memory_space<vmem>>, vector<8x1xf32>,
    return
  }
  func.func @transform_0(%arg0: i32) -> (i32, i32) {
    %c0_i32 = arith.constant 0 : i32
    %c0_i32_0 = arith.constant 0 : i32
    return %arg0, %c0_i32 : i32, i32
  }
  func.func @transform_1(%arg0: i32) -> (i32, i32) {
    %c0_i32 = arith.constant 0 : i32
    %c0_i32_0 = arith.constant 0 : i32
    %c0_i32_1 = arith.constant 0 : i32
    return %c0_i32, %c0_i32_0 : i32, i32
  }
  func.func @transform_2(%arg0: i32) -> (i32, i32) {
    %c0_i32 = arith.constant 0 : i32
    %c0_i32_0 = arith.constant 0 : i32
    %c0_i32_1 = arith.constant 0 : i32
    return %c0_i32, %c0_i32_0 : i32, i32
  }
  func.func @transform_3(%arg0: i32) -> (i32, i32) {
    %c0_i32 = arith.constant 0 : i32
    %c0_i32_0 = arith.constant 0 : i32
    %c0_i32_1 = arith.constant 0 : i32
    return %c0_i32, %c0_i32_0 : i32, i32
  }
  func.func @transform_4(%arg0: i32) -> (i32, i32) {
    %c0_i32 = arith.constant 0 : i32
    %c0_i32_0 = arith.constant 0 : i32
    %c0_i32_1 = arith.constant 0 : i32
    return %c0_i32, %c0_i32_0 : i32, i32
  }
  func.func @transform_5(%arg0: i32) -> (i32, i32) {
    %c0_i32 = arith.constant 0 : i32
    %c0_i32_0 = arith.constant 0 : i32
    %c0_i32_1 = arith.constant 0 : i32
    return %c0_i32, %c0_i32_0 : i32, i32
  }
  func.func @transform_6(%arg0: i32) -> (i32, i32) {
    %c0_i32 = arith.constant 0 : i32
    %c0_i32_0 = arith.constant 0 : i32
    %c0_i32_1 = arith.constant 0 : i32
    return %c0_i32, %c0_i32_0 : i32, i32
  }
  func.func @transform_7(%arg0: i32) -> (i32, i32) {
    %c0_i32 = arith.constant 0 : i32
    %c0_i32_0 = arith.constant 0 : i32
    return %arg0, %c0_i32 : i32, i32
  }
}

</mosaic_0001>

<bundles_post_ra>
// kernel: tpu_custom_call.1
= control target key start
LH: loop header
LB: loop body
LE: loop exit
PB: predicated region body
PF: predicated region fallthrough
CT: control target
= control target key end

     0   :  { %s699_s0 = inlined_call_operand.hbm [shape: bf16[8,256], index: 0, kind: input, shape index: {}]   ;;  %s700_s1 = inlined_call_operand.hbm [shape: bf16[256,128], index: 1, kind: input, shape index: {}]   ;;  %s701_s2 = inlined_call_operand.vmem [shape: f32[1,128], index: 2, kind: input, shape index: {}]   ;;  %s702_s3 = inlined_call_operand.hbm [shape: bf16[128,128], index: 3, kind: input, shape index: {}]   ;;  %s703_s4 = inlined_call_operand.vmem [shape: f32[1,128], index: 4, kind: input, shape index: {}]   ;;  %s704_s5 = inlined_call_operand.vmem [shape: f32[1,128], index: 5, kind: input, shape index: {}]   ;;  %s705_s6 = inlined_call_operand.<no memory space> [shape: f32[1,1], index: 6, kind: input, shape index: {}]   ;;  %s706_s7 = inlined_call_operand.vmem [shape: f32[8,1], index: 7, kind: output, shape index: {}]  }
   0x1   :  { %v12_v0 = vstv %s705_s6 }
   0x2   :  { %13 = vst [vmem:[#allocation2] sm:$0x1] %v12_v0 }
   0x3   :  { %14 = vsyncpa [#allocation4], 0 }
   0x4   :  { %15 = vsyncpa [#allocation6], 0  ;;  %s586_s26 = smov [#allocation5]   ;;  %s516_s30 = scalar_lea.hbm %s700_s1, 2048 }
   0x5   :  { %s31_s27 = sshll.u32 %s586_s26, 4  ;;  %p517_p0 = scmp.ne.s32.totalorder %s700_s1, %s516_s30  ;;  %s32_s27 = int_to_ptr.vmem [resolvable:$true] %s31_s27 }
   0x6   :  { %p520_p1 = scmp.lt.u32.totalorder %s516_s30, %s700_s1 }
   0x8   :  { %p522_p2 = pnand %p520_p1, %p517_p0 }
   0xa   :  { %525 = shalt.err (!%p522_p2)
}
   0xb   :  { %s526_s6 = scalar_lea.vmem %s32_s27, 2048  ;;  %p531_p4 = scmp.lt.s32.totalorder %s32_s27, %s32_s27 }
   0xc   :  { %p527_p3 = scmp.ne.s32.totalorder %s32_s27, %s526_s6  ;;  %p532_p5 = scmp.lt.s32.totalorder %s526_s6, %s526_s6 }
   0xe   :  { %p533_p6 = por %p532_p5, %p531_p4 }
  0x10   :  { %p534_p7 = pnand %p533_p6, %p527_p3 }
  0x12   :  { %537 = shalt.err (!%p534_p7)
}
  0x13   :  { %s587_s12 = smov 64   ;;  %s588_s13 = smov 4  }
  0x14   :  { %37 = dma.hbm_to_vmem [thread:$0]  %s700_s1, 2048, %s32_s27, [#allocation6], %s587_s12, %s587_s12, %s588_s13  }
  0x15   :  { %s589_s16 = smov [#allocation3]   ;;  %s590_s18 = smov [#allocation7]  }
  0x16   :  { %s22_s17 = sshll.u32 %s589_s16, 4  ;;  %s45_s19 = sshll.u32 %s590_s18, 4  ;;  %s23_s17 = int_to_ptr.vmem [resolvable:$true] %s22_s17  ;;  %s46_s19 = int_to_ptr.vmem [resolvable:$true] %s45_s19 }
  0x17   :  { %s538_s22 = scalar_lea.hbm %s699_s0, 128 }
  0x18   :  { %p539_p8 = scmp.ne.s32.totalorder %s699_s0, %s538_s22  ;;  %p542_p9 = scmp.lt.u32.totalorder %s538_s22, %s699_s0 }
  0x1a   :  { %p544_p10 = pnand %p542_p9, %p539_p8 }
  0x1c   :  { %547 = shalt.err (!%p544_p10)
}
  0x1d   :  { %s548_s1 = scalar_lea.vmem %s23_s17, 128  ;;  %p553_p12 = scmp.lt.s32.totalorder %s23_s17, %s23_s17 }
  0x1e   :  { %p549_p11 = scmp.ne.s32.totalorder %s23_s17, %s548_s1  ;;  %p554_p13 = scmp.lt.s32.totalorder %s548_s1, %s548_s1 }
  0x20   :  { %p555_p0 = por %p554_p13, %p553_p12 }
  0x22   :  { %p556_p1 = pnand %p555_p0, %p549_p11 }
  0x24   :  { %559 = shalt.err (!%p556_p1)
}
  0x25   :  { %25 = dma.hbm_to_vmem [thread:$0]  %s699_s0, 128, %s23_s17, [#allocation4]  }
  0x26   :  { %s560_s8 = scalar_lea.hbm %s702_s3, 1024 }
  0x27   :  { %p561_p2 = scmp.ne.s32.totalorder %s702_s3, %s560_s8  ;;  %p564_p3 = scmp.lt.u32.totalorder %s560_s8, %s702_s3 }
  0x29   :  { %p566_p4 = pnand %p564_p3, %p561_p2 }
  0x2b   :  { %569 = shalt.err (!%p566_p4)
}
  0x2c   :  { %s570_s14 = scalar_lea.vmem %s46_s19, 1024  ;;  %p575_p6 = scmp.lt.s32.totalorder %s46_s19, %s46_s19 }
  0x2d   :  { %p571_p5 = scmp.ne.s32.totalorder %s46_s19, %s570_s14  ;;  %p576_p7 = scmp.lt.s32.totalorder %s570_s14, %s570_s14 }
  0x2f   :  { %p577_p8 = por %p576_p7, %p575_p6 }
  0x31   :  { %p578_p9 = pnand %p577_p8, %p571_p5 }
  0x33   :  { %581 = shalt.err (!%p578_p9)
}
  0x34   :  { %51 = dma.hbm_to_vmem [thread:$0]  %s702_s3, 1024, %s46_s19, [#allocation6], %s587_s12, %s587_s12, %s588_s13  }
  0x35   :  { %582 = dma.done.wait [#allocation4], 128  }
  0x36   :  { %583 = vsyncadd [#allocation4], 4294967168 }
  0x37   :  { %584 = dma.done.wait [#allocation6], 3072  }
  0x38   :  { %585 = vsyncadd [#allocation6], 4294964224  ;;  %v591_v1 = vmov 0.0   ;;  %v486_v2 = vld [vmem:[#allocation5 + $0x40] sm:$0xff]   ;;  %v488_v4 = vld [vmem:[#allocation5 + $0x48] sm:$0xff]   ;;  %vm592_vm0 = vmmov 0  }
  0x39   :  { %459 = vmatprep.subr.bf16.mxu1 %v591_v1  ;;  %v487_v3 = vld [vmem:[#allocation5] sm:$0xff]   ;;  %428 = vmatprep.subr.bf16.mxu0 %v486_v2  ;;  %v489_v5 = vld [vmem:[#allocation5 + $0x8] sm:$0xff]   ;;  %v490_v6 = vld [vmem:[#allocation5 + $0x50] sm:$0xff]   ;;  %vm390_vm1 = vcmask 7168  }
  0x3a   :  { %429 = vmatpush3.bf16.msra.mxu0 %v487_v3  ;;  %v491_v7 = vld [vmem:[#allocation5 + $0x10] sm:$0xff]   ;;  %v492_v8 = vld [vmem:[#allocation5 + $0x58] sm:$0xff]   ;;  %v494_v10 = vld [vmem:[#allocation5 + $0x60] sm:$0xff]   ;;  %475 = vmatprep.mubr.msk.bf16.mxu1 %vm592_vm0, %v591_v1 }
  0x3b   :  { %430 = vmatprep.subr.bf16.mxu0 %v488_v4  ;;  %v493_v9 = vld [vmem:[#allocation5 + $0x18] sm:$0xff]   ;;  %v495_v11 = vld [vmem:[#allocation5 + $0x20] sm:$0xff]   ;;  %v496_v12 = vld [vmem:[#allocation5 + $0x68] sm:$0xff]  }
  0x3c   :  { %v68_v13 = vld [vmem:[#allocation3] sm:$0xff]  ;;  %v504_v15 = vld [vmem:[#allocation7] sm:$0xff]   ;;  %v497_v16 = vld [vmem:[#allocation5 + $0x28] sm:$0xff]  }
  0x3d   :  { %v400_v14 = vcombine.high %v68_v13, %v68_v13  ;;  %v498_v17 = vld [vmem:[#allocation5 + $0x70] sm:$0xff]   ;;  %460 = vmatpush3.bf16.msra.mxu1 %v504_v15  ;;  %v505_v18 = vld [vmem:[#allocation7 + $0x8] sm:$0xff]   ;;  %v500_v20 = vld [vmem:[#allocation5 + $0x78] sm:$0xff]   ;;  %v399_v24 = vcombine.low %v68_v13, %v68_v13 }
  0x3e   :  { %431 = vmatpush3.bf16.msra.mxu0 %v489_v5  ;;  %461 = vmatprep.subr.bf16.mxu1 %v591_v1  ;;  %v499_v19 = vld [vmem:[#allocation5 + $0x30] sm:$0xff]   ;;  %v501_v22 = vld [vmem:[#allocation5 + $0x38] sm:$0xff]   ;;  %v508_v25 = vld [vmem:[#allocation7 + $0x20] sm:$0xff]  }
  0x3f   :  { %432 = vmatprep.subr.bf16.mxu0 %v490_v6  ;;  %243 = vmatprep.mubr.bf16.mxu0 %v400_v14  ;;  %v506_v21 = vld [vmem:[#allocation7 + $0x10] sm:$0xff]   ;;  %v507_v23 = vld [vmem:[#allocation7 + $0x18] sm:$0xff]   ;;  %v509_v26 = vld [vmem:[#allocation7 + $0x28] sm:$0xff]  }
  0x40   :  { %v510_v27 = vld [vmem:[#allocation7 + $0x30] sm:$0xff]   ;;  %v511_v28 = vld [vmem:[#allocation7 + $0x38] sm:$0xff]  }
  0x41   :  { %462 = vmatpush3.bf16.msra.mxu1 %v505_v18  ;;  %v398_v30 = vld [vmem:[%s701_s2] ss:$0 sm:$0xff] }
  0x42   :  { %433 = vmatpush3.bf16.msra.mxu0 %v491_v7  ;;  %463 = vmatprep.subr.bf16.mxu1 %v591_v1  ;;  %v417_v38 = vld [vmem:[%s703_s4] ss:$0 sm:$0xff] }
  0x43   :  { %434 = vmatprep.subr.bf16.mxu0 %v492_v8  ;;  %v426_v43 = vld [vmem:[%s704_s5] ss:$0 sm:$0xff] }
  0x44   :  { %v427_v47 = vld [vmem:[#allocation2] ss:$0 sm:$0xff] }
  0x45   :  { %464 = vmatpush3.bf16.msra.mxu1 %v506_v21 }
  0x46   :  { %435 = vmatpush3.bf16.msra.mxu0 %v493_v9  ;;  %465 = vmatprep.subr.bf16.mxu1 %v591_v1 }
  0x47   :  { %436 = vmatprep.subr.bf16.mxu0 %v494_v10 }
  0x49   :  { %466 = vmatpush3.bf16.msra.mxu1 %v507_v23 }
  0x4a   :  { %437 = vmatpush3.bf16.msra.mxu0 %v495_v11  ;;  %467 = vmatprep.subr.bf16.mxu1 %v591_v1 }
  0x4b   :  { %438 = vmatprep.subr.bf16.mxu0 %v496_v12 }
  0x4d   :  { %468 = vmatpush3.bf16.msra.mxu1 %v508_v25 }
  0x4e   :  { %439 = vmatpush3.bf16.msra.mxu0 %v497_v16  ;;  %469 = vmatprep.subr.bf16.mxu1 %v591_v1 }
  0x4f   :  { %440 = vmatprep.subr.bf16.mxu0 %v498_v17 }
  0x51   :  { %470 = vmatpush3.bf16.msra.mxu1 %v509_v26 }
  0x52   :  { %441 = vmatpush3.bf16.msra.mxu0 %v499_v19  ;;  %471 = vmatprep.subr.bf16.mxu1 %v591_v1 }
  0x53   :  { %442 = vmatprep.subr.bf16.mxu0 %v500_v20 }
  0x55   :  { %472 = vmatpush3.bf16.msra.mxu1 %v510_v27 }
  0x56   :  { %443 = vmatpush3.bf16.msra.mxu0 %v501_v22  ;;  %473 = vmatprep.subr.bf16.mxu1 %v591_v1 }
  0x59   :  { %244 = vmatmul.mubr.bf16.vlgmr.msra.gmra.mrb[0].mxu0 %v399_v24  ;;  %474 = vmatpush3.bf16.msra.mxu1 %v511_v28 }
 0x12c   :  { %v444_v29 = vpop.f32.mrb[0].mxu0 }
 0x12d   :  { %v445_v31 = vpop.f32.mrb[1].mxu0 }
 0x12e   :  { %v446_v32 = vadd.f32 %v445_v31, %v444_v29  ;;  %v447_v33 = vpop.f32.mrb[2].mxu0 }
 0x12f   :  { %v448_v34 = vpop.f32.mrb[3].mxu0 }
 0x130   :  { %v246_v35 = vadd.f32 %v446_v32, %v398_v30 }
 0x132   :  { %v251_v36 = vmax.f32 %v246_v35, 0.0 }
 0x134   :  { %v252_v37 = vpack.c.bf16 %v251_v36, %v251_v36 }
 0x136   :  { %476 = vmatmul.mubr.bf16.vlgmr.msra.gmra.mrb[0].mxu1 %v252_v37 }
 0x209   :  { %v358_v39 = vpop.f32.mrb[0].mxu1 }
 0x20a   :  { %v359_v40 = vadd.f32 %v417_v38, %v358_v39  ;;  %v477_v41 = vpop.f32.mrb[1].mxu1 }
 0x20b   :  { %v361_v42 = vpop.f32.mrb[2].mxu1 }
 0x20c   :  { %v364_v44 = vmax.f32 %v359_v40, 0.0  ;;  %v478_v45 = vpop.f32.mrb[3].mxu1 }
 0x20e   :  { %v372_v46 = vmul.f32 %v426_v43, %v364_v44 }
 0x210   :  { %373 = vadd.xlane.f32.xlu0 %v372_v46 }
 0x29d   :  { %v374_v48 = vpop.xlane.xlu0 %373 }
 0x29e   :  { %v382_v49 = vadd.f32 %v427_v47, %v374_v48 }
 0x2a0   :  { %v383_v50 = vsub.f32 0.0, %v382_v49 }
 0x2a2   :  { %v384_v51 = vmul.f32 1.442695, %v383_v50 }
 0x2a4   :  { %512 = vpow2.f32 %v384_v51 }
 0x2ae   :  { %v513_v52 = vpop.eup %512 }
 0x2af   :  { %v386_v53 = vadd.f32 1.0, %v513_v52 }
 0x2b1   :  { %514 = vrcp.f32 %v386_v53 }
 0x2bb   :  { %v515_v54 = vpop.eup %514 }
 0x2bc   :  { %v388_v55 = vmax.f32 %v515_v54, 0.0 }
 0x2be   :  { %v389_v56 = vmin.f32 %v388_v55, 1.0 }
 0x2c0   :  { %391 = vst.msk [vmem:[%s706_s7] sm:$0xff] %vm390_vm1, %v389_v56 }
 0x2c1   :  { %396 = vsyncpa [#allocation4], 1 }
 0x2c2   :  { %397 = vsyncpa [#allocation6], 1 }

</bundles_post_ra>
